<compile_context>
chip_gen: v5e
topology: v5e:2x2
jax: 0.10.0
libtpu: 0.0.40
codegen_flags: <defaults>
</compile_context>

<pallas_src>
import functools

import jax
import jax.numpy as jnp
from jax.experimental import pallas as pl
from jax.experimental.pallas import tpu as pltpu

LANE = 128
SUBLANE = 8


def _round_up(x, m):
    return ((x + m - 1) // m) * m


def dqn_kernel(x_ref, w1_ref, b1_ref, w2_ref, b2_ref, o_ref, *, out_dim):
    # fc1 + ReLU (MXU matmul, f32 accumulate; elementwise stays f32 for v5e).
    h = jnp.dot(x_ref[...], w1_ref[...], preferred_element_type=jnp.float32)
    h = jnp.maximum(h + b1_ref[...], 0.0)
    # fc2 against the lane-padded weight tile; store only the real Q columns
    # (masked vst of out_dim lanes instead of a 128-lane padded writeback).
    q = jnp.dot(h, w2_ref[...], preferred_element_type=jnp.float32) + b2_ref[...]
    o_ref[...] = q[:, :out_dim].astype(o_ref.dtype)


def prepare_params(w1, b1, w2, b2):
    """One-time (static) prep: pad fc2 weights/bias to a lane-dense width."""
    hid, out_dim = w2.shape
    n_pad = _round_up(out_dim, LANE)
    if n_pad != out_dim:
        w2p = jnp.zeros((hid, n_pad), w2.dtype).at[:, :out_dim].set(w2)
        b2p = jnp.zeros((1, n_pad), b2.dtype).at[:, :out_dim].set(b2)
    else:
        w2p, b2p = w2, b2.reshape(1, -1)
    return w1, b1.reshape(1, -1), w2p, b2p


def dqn_forward(x, w1, b1, w2p, b2p, *, out_dim, tile_b=None):
    """x:(B,in) f32, w1:(in,128), b1:(1,128), w2p:(128,n_pad), b2p:(1,n_pad)."""
    B, in_dim = x.shape
    hid = w1.shape[1]
    n_pad = w2p.shape[1]

    if tile_b is None:
        # Default: two grid steps (both v7x TensorCores busy; negligible extra
        # step cost on single-TC v5e/v6e), capped for VMEM headroom.
        tile_b = min(4096, max(SUBLANE, _round_up(pl.cdiv(B, 2), SUBLANE)))
    tile_b = max(SUBLANE, _round_up(min(int(tile_b), _round_up(B, SUBLANE)), SUBLANE))

    grid = (pl.cdiv(B, tile_b),)  # partial last block masked by Pallas

    flops = 2 * B * (in_dim * hid + hid * n_pad)
    bytes_accessed = 4 * (
        B * in_dim + in_dim * hid + hid + hid * n_pad + n_pad + B * out_dim
    )

    kernel = functools.partial(dqn_kernel, out_dim=out_dim)

    return pl.pallas_call(
        kernel,
        out_shape=jax.ShapeDtypeStruct((B, out_dim), x.dtype),
        grid_spec=pltpu.PrefetchScalarGridSpec(
            num_scalar_prefetch=0,
            grid=grid,
            in_specs=[
                pl.BlockSpec((tile_b, in_dim), lambda i: (i, 0)),  # x tile
                pl.BlockSpec((in_dim, hid), lambda i: (0, 0)),     # w1 resident
                pl.BlockSpec((1, hid), lambda i: (0, 0)),          # b1 resident
                pl.BlockSpec((hid, n_pad), lambda i: (0, 0)),      # w2 resident
                pl.BlockSpec((1, n_pad), lambda i: (0, 0)),        # b2 resident
            ],
            out_specs=pl.BlockSpec((tile_b, out_dim), lambda i: (i, 0)),
        ),
        compiler_params=pltpu.CompilerParams(
            # batch axis is independent -> shard across TensorCores (v7x megacore)
            dimension_semantics=("parallel",),
        ),
        cost_estimate=pl.CostEstimate(
            flops=flops, transcendentals=0, bytes_accessed=bytes_accessed
        ),
    )(x, w1, b1, w2p, b2p)


def init_params(key, input_dim, hidden_dim, output_dim):
    # Deterministic synthetic init (PyTorch-style uniform bounds), not a checkpoint.
    k1, k2, k3, k4 = jax.random.split(key, 4)
    bound1 = 1.0 / jnp.sqrt(input_dim)
    bound2 = 1.0 / jnp.sqrt(hidden_dim)
    w1 = jax.random.uniform(k1, (input_dim, hidden_dim), jnp.float32, -bound1, bound1)
    b1 = jax.random.uniform(k2, (1, hidden_dim), jnp.float32, -bound1, bound1)
    w2 = jax.random.uniform(k3, (hidden_dim, output_dim), jnp.float32, -bound2, bound2)
    b2 = jax.random.uniform(k4, (1, output_dim), jnp.float32, -bound2, bound2)
    return w1, b1, w2, b2


if __name__ == "__main__":
    key = jax.random.PRNGKey(0)
    batch, input_dim, hidden_dim, output_dim = 64, 16, 128, 8

    kx, kp = jax.random.split(key)
    x = jax.random.normal(kx, (batch, input_dim), jnp.float32)
    w1, b1, w2, b2 = init_params(kp, input_dim, hidden_dim, output_dim)
    params = prepare_params(w1, b1, w2, b2)  # hoisted, static across steps

    fwd = jax.jit(dqn_forward, static_argnames=("out_dim", "tile_b"))

    out = jax.block_until_ready(fwd(x, *params, out_dim=output_dim))

    # Pure-JAX reference check of the same math.
    ref = jnp.maximum(x @ w1 + b1, 0.0) @ w2 + b2
    assert out.shape == (batch, output_dim)
    assert jnp.allclose(out, ref, atol=1e-4, rtol=1e-4)

    # Partial last block path (batch not a multiple of the 8-row sublane tile).
    x_small = x[:5]
    out_small = jax.block_until_ready(fwd(x_small, *params, out_dim=output_dim))
    assert out_small.shape == (5, output_dim)
    assert jnp.allclose(out_small, ref[:5], atol=1e-4, rtol=1e-4)

    print("KERNEL_OK")
</pallas_src>

<mosaic_0001>
module attributes {stable_mosaic.version = 11 : i64} {
  func.func @dqn_kernel(%arg0: i32, %arg1: memref<32x16xf32, #tpu.memory_space<vmem>>, %arg2: memref<16x128xf32, #tpu.memory_space<vmem>>, %arg3: memref<1x128xf32, #tpu.memory_space<vmem>>, %arg4: memref<128x128xf32, #tpu.memory_space<vmem>>, %arg5: memref<1x128xf32, #tpu.memory_space<vmem>>, %arg6: memref<32x8xf32, #tpu.memory_space<vmem>>) attributes {dimension_semantics = [#tpu.dimension_semantics<parallel>], iteration_bounds = array<i64: 2>, scalar_prefetch = 0 : i64, scratch_operands = 0 : i64, tpu.core_type = #tpu.core_type<tc>, window_params = [{transform_indices = @transform_0, window_bounds = array<i64: 32, 16>}, {pipeline_mode = #tpu.pipeline_mode<synchronous>, transform_indices = @transform_1, window_bounds = array<i64: 16, 128>}, {pipeline_mode = #tpu.pipeline_mode<synchronous>, transform_indices = @transform_2, window_bounds = array<i64: 1, 128>}, {pipeline_mode = #tpu.pipeline_mode<synchronous>, transform_indices = @transform_3, window_bounds = array<i64: 128, 128>}, {pipeline_mode = #tpu.pipeline_mode<synchronous>, transform_indices = @transform_4, window_bounds = array<i64: 1, 128>}, {transform_indices = @transform_5, window_bounds = array<i64: 32, 8>}]} {
    %c0 = arith.constant 0 : index
    %c0_0 = arith.constant 0 : index
    %0 = vector.load %arg1[%c0, %c0_0] : memref<32x16xf32, #tpu.memory_space<vmem>>, vector<32x16xf32>
    %c0_1 = arith.constant 0 : index
    %c0_2 = arith.constant 0 : index
    %1 = vector.load %arg2[%c0_1, %c0_2] : memref<16x128xf32, #tpu.memory_space<vmem>>, vector<16x128xf32>
    %cst = arith.constant dense<0.000000e+00> : vector<32x128xf32>
    %2 = tpu.matmul %0, %1, %cst {dimension_numbers = #tpu.dot_dimension_numbers<[1], [0], [0], [1], [0, 0, 1, 1], [], []>} : vector<32x16xf32>, vector<16x128xf32>, vector<32x128xf32> -> vector<32x128xf32>
    %c0_3 = arith.constant 0 : index
    %c0_4 = arith.constant 0 : index
    %3 = vector.load %arg3[%c0_3, %c0_4] : memref<1x128xf32, #tpu.memory_space<vmem>>, vector<1x128xf32>
    %4 = vector.broadcast %3 : vector<1x128xf32> to vector<32x128xf32>
    %5 = arith.addf %2, %4 : vector<32x128xf32>
    %cst_5 = arith.constant 0.000000e+00 : f32
    %6 = vector.broadcast %cst_5 : f32 to vector<32x128xf32>
    %7 = arith.maximumf %5, %6 : vector<32x128xf32>
    %c0_6 = arith.constant 0 : index
    %c0_7 = arith.constant 0 : index
    %8 = vector.load %arg4[%c0_6, %c0_7] : memref<128x128xf32, #tpu.memory_space<vmem>>, vector<128x128xf32>
    %cst_8 = arith.constant dense<0.000000e+00> : vector<32x128xf32>
    %9 = tpu.matmul %7, %8, %cst_8 {dimension_numbers = #tpu.dot_dimension_numbers<[1], [0], [0], [1], [0, 0, 1, 1], [], []>} : vector<32x128xf32>, vector<128x128xf32>, vector<32x128xf32> -> vector<32x128xf32>
    %c0_9 = arith.constant 0 : index
    %c0_10 = arith.constant 0 : index
    %10 = vector.load %arg5[%c0_9, %c0_10] : memref<1x128xf32, #tpu.memory_space<vmem>>, vector<1x128xf32>
    %11 = vector.broadcast %10 : vector<1x128xf32> to vector<32x128xf32>
    %12 = arith.addf %9, %11 : vector<32x128xf32>
    %13 = vector.extract_strided_slice %12 {offsets = [0, 0], sizes = [32, 8], strides = [1, 1]} : vector<32x128xf32> to vector<32x8xf32>
    %c0_11 = arith.constant 0 : index
    %c0_12 = arith.constant 0 : index
    %14 = vector.load %arg6[%c0_11, %c0_12] : memref<32x8xf32, #tpu.memory_space<vmem>>, vector<32x8xf32>
    tpu.vector_store %arg6[%c0_11, %c0_12], %13 {strides = array<i32>} : memref<32x8xf32, #tpu.memory_space<vmem>>, vector<32x8xf32>,
    return
  }
  func.func @transform_0(%arg0: i32) -> (i32, i32) {
    %c0_i32 = arith.constant 0 : i32
    %c0_i32_0 = arith.constant 0 : i32
    return %arg0, %c0_i32 : i32, i32
  }
  func.func @transform_1(%arg0: i32) -> (i32, i32) {
    %c0_i32 = arith.constant 0 : i32
    %c0_i32_0 = arith.constant 0 : i32
    %c0_i32_1 = arith.constant 0 : i32
    return %c0_i32, %c0_i32_0 : i32, i32
  }
  func.func @transform_2(%arg0: i32) -> (i32, i32) {
    %c0_i32 = arith.constant 0 : i32
    %c0_i32_0 = arith.constant 0 : i32
    %c0_i32_1 = arith.constant 0 : i32
    return %c0_i32, %c0_i32_0 : i32, i32
  }
  func.func @transform_3(%arg0: i32) -> (i32, i32) {
    %c0_i32 = arith.constant 0 : i32
    %c0_i32_0 = arith.constant 0 : i32
    %c0_i32_1 = arith.constant 0 : i32
    return %c0_i32, %c0_i32_0 : i32, i32
  }
  func.func @transform_4(%arg0: i32) -> (i32, i32) {
    %c0_i32 = arith.constant 0 : i32
    %c0_i32_0 = arith.constant 0 : i32
    %c0_i32_1 = arith.constant 0 : i32
    return %c0_i32, %c0_i32_0 : i32, i32
  }
  func.func @transform_5(%arg0: i32) -> (i32, i32) {
    %c0_i32 = arith.constant 0 : i32
    %c0_i32_0 = arith.constant 0 : i32
    return %arg0, %c0_i32 : i32, i32
  }
}

</mosaic_0001>

<bundles_post_ra>
// kernel: dqn_forward.1
= control target key start
LH: loop header
LB: loop body
LE: loop exit
PB: predicated region body
PF: predicated region fallthrough
CT: control target
= control target key end

     0   :  { %10 = vsyncpa [#allocation3], 0  ;;  %s586_s18 = smov 0   ;;  %s635_s0 = inlined_call_operand.vmem [shape: f32[64,16], index: 0, kind: input, shape index: {}]   ;;  %s636_s1 = inlined_call_operand.vmem [shape: f32[16,128], index: 1, kind: input, shape index: {}]   ;;  %s637_s2 = inlined_call_operand.vmem [shape: f32[1,128], index: 2, kind: input, shape index: {}]   ;;  %s638_s3 = inlined_call_operand.hbm [shape: f32[128,128], index: 3, kind: input, shape index: {}]   ;;  %s639_s4 = inlined_call_operand.vmem [shape: f32[1,128], index: 4, kind: input, shape index: {}]   ;;  %s640_s5 = inlined_call_operand.vmem [shape: f32[64,8], index: 5, kind: output, shape index: {}]  }
   0x1 LB: > { %s174_s21 = sshll.u32 %s638_s3, 4  ;;  %s423_s22 = sadd.s32 4294967295, %s551_s18   ;;  %s551_s18 = sphi %s586_s18, %s16_s18   ;;  %s175_s21 = int_to_ptr.hbm [resolvable:$true] %s174_s21 }
   0x2   : > { %p425_p0 = scmp.ge.s32.totalorder %s551_s18, 1  ;;  %p157_p1 = scmp.lt.s32.totalorder %s551_s18, 3 }
   0x3   : > { %p496_p2 = scmp.eq.s32.totalorder %s423_s22, 0  ;;  %s553_s23 = smov [#allocation2]  }
   0x4   : > { %p158_p3 = pnand %p425_p0, %p157_p1  ;;  %s176_s24 = sshll.u32 %s553_s23, 4  ;;  %s177_s24 = int_to_ptr.vmem [resolvable:$true] %s176_s24 }
   0x5   : > { %s554_s25 = smov 128   ;;  %s555_s26 = smov 8  }
   0x6   : > { %p492_p4 = pneg %p158_p3  ;;  %204 = sbr.rel (%p158_p3) target bundleno = 308 (0x134), region = 40 }
   0x8   : > { %p493_p5 = pnand %p496_p2, %p492_p4 }
   0xa   : > { %495 = dma.hbm_to_vmem [thread:$0]  (!%p493_p5), %s175_s21, 2048, %s177_s24, [#allocation3], %s554_s25, %s554_s25, %s555_s26  }
   0xb   : > { %546 = dma.done.wait (%p496_p2), [#allocation3], 2048  }
   0xc   : > { %548 = vsyncadd (%p496_p2), [#allocation3], 4294965248  ;;  %s430_s27 = sshll.u32 %s423_s22, 2  ;;  %v250_v0 = vld [vmem:[%s636_s1 + $0x8] sm:$0xff]  ;;  %v249_v1 = vld [vmem:[%s636_s1] sm:$0xff]  ;;  %vm255_vm0 = vcmask 130048  }
   0xd   : > { %p234_p6 = scmp.lt.s32.totalorder %s430_s27, 7  ;;  %282 = vmatpush.msra.mxu0 %v250_v0  ;;  %v316_v3 = vld [vmem:[#allocation2 + $0x78] sm:$0xff]  ;;  %v315_v4 = vld [vmem:[#allocation2 + $0x70] sm:$0xff]  ;;  %v314_v5 = vld [vmem:[#allocation2 + $0x68] sm:$0xff]  ;;  %vm350_vm1 = vcmask 64512  }
   0xe   : > { %440 = vmatpush.msra.mxu1 %v316_v3  ;;  %441 = vmatpush.msra.mxu2 %v316_v3  ;;  %v313_v6 = vld [vmem:[#allocation2 + $0x60] sm:$0xff]  ;;  %v312_v8 = vld [vmem:[#allocation2 + $0x58] sm:$0xff]  ;;  %v311_v9 = vld [vmem:[#allocation2 + $0x50] sm:$0xff] }
   0xf   : > { %s642_s27 = smov (!%p234_p6, %s430_s27), 7  ;;  %283 = vmatpush.msra.mxu0 %v249_v1  ;;  %442 = vmatpush.msra.mxu3 %v316_v3  ;;  %v310_v10 = vld [vmem:[#allocation2 + $0x48] sm:$0xff]  ;;  %v309_v11 = vld [vmem:[#allocation2 + $0x40] sm:$0xff]  ;;  %v308_v13 = vld [vmem:[#allocation2 + $0x38] sm:$0xff] }
  0x10   : > { %s431_s28 = sshll.u32 %s642_s27, 3  ;;  %443 = vmatpush.msra.mxu1 %v315_v4  ;;  %444 = vmatpush.msra.mxu2 %v315_v4  ;;  %v307_v14 = vld [vmem:[#allocation2 + $0x30] sm:$0xff]  ;;  %v306_v15 = vld [vmem:[#allocation2 + $0x28] sm:$0xff]  ;;  %v305_v16 = vld [vmem:[#allocation2 + $0x20] sm:$0xff] }
  0x11   : > { %s605_s6 = scalar_lea.vmem %s635_s0, %s431_s28  ;;  %321 = vmatpush.msrb.mxu0 %v316_v3  ;;  %445 = vmatpush.msra.mxu3 %v315_v4  ;;  %v304_v18 = vld [vmem:[#allocation2 + $0x18] sm:$0xff]  ;;  %v303_v19 = vld [vmem:[#allocation2 + $0x10] sm:$0xff]  ;;  %v302_v20 = vld [vmem:[#allocation2 + $0x8] sm:$0xff]  ;;  %s243_s17 = scalar_lea.vmem %s640_s5, %s431_s28 }
  0x12   : > { %v245_v2 = vld [vmem:[%s605_s6] sm:$0xff]  ;;  %446 = vmatpush.msra.mxu1 %v314_v5  ;;  %447 = vmatpush.msra.mxu2 %v314_v5  ;;  %v246_v7 = vld [vmem:[%s605_s6 + $0x8] sm:$0xff]  ;;  %v247_v12 = vld [vmem:[%s605_s6 + $0x10] sm:$0xff] }
  0x13   : > { %434 = vmatmul.msk.f32.vlgmr.msra.gmra.mxu0 %vm255_vm0, %v245_v2  ;;  %448 = vmatpush.msra.mxu3 %v314_v5  ;;  %v248_v17 = vld [vmem:[%s605_s6 + $0x18] sm:$0xff]  ;;  %v301_v21 = vld [vmem:[#allocation2] sm:$0xff] }
  0x14   : > { %322 = vmatpush.msrb.mxu0 %v315_v4  ;;  %449 = vmatpush.msra.mxu1 %v313_v6  ;;  %v509_v22 = vld [vmem:[%s637_s2] ss:$0 sm:$0xff] }
  0x15   : > { %450 = vmatpush.msra.mxu2 %v313_v6  ;;  %451 = vmatpush.msra.mxu3 %v313_v6  ;;  %v510_v35 = vld [vmem:[%s639_s4] ss:$0 sm:$0xff] }
  0x16   : > { %323 = vmatpush.msrb.mxu0 %v314_v5  ;;  %452 = vmatpush.msra.mxu1 %v312_v8 }
  0x17   : > { %453 = vmatpush.msra.mxu2 %v312_v8  ;;  %454 = vmatpush.msra.mxu3 %v312_v8 }
  0x18   : > { %324 = vmatpush.msrb.mxu0 %v313_v6  ;;  %455 = vmatpush.msra.mxu1 %v311_v9 }
  0x19   : > { %456 = vmatpush.msra.mxu2 %v311_v9  ;;  %457 = vmatpush.msra.mxu3 %v311_v9 }
  0x1a   : > { %325 = vmatpush.msrb.mxu0 %v312_v8  ;;  %458 = vmatpush.msra.mxu1 %v310_v10 }
  0x1b   : > { %435 = vmatmul.msk.f32.gmra.mxu0 %vm255_vm0, %v246_v7  ;;  %459 = vmatpush.msra.mxu2 %v310_v10 }
  0x1c   : > { %326 = vmatpush.msrb.mxu0 %v311_v9  ;;  %461 = vmatpush.msra.mxu1 %v309_v11 }
  0x1d   : > { %462 = vmatpush.msra.mxu2 %v309_v11  ;;  %460 = vmatpush.msra.mxu3 %v310_v10 }
  0x1e   : > { %327 = vmatpush.msrb.mxu0 %v310_v10  ;;  %464 = vmatpush.msra.mxu1 %v308_v13 }
  0x1f   : > { %465 = vmatpush.msra.mxu2 %v308_v13  ;;  %463 = vmatpush.msra.mxu3 %v309_v11 }
  0x20   : > { %328 = vmatpush.msrb.mxu0 %v309_v11  ;;  %467 = vmatpush.msra.mxu1 %v307_v14 }
  0x21   : > { %468 = vmatpush.msra.mxu2 %v307_v14  ;;  %466 = vmatpush.msra.mxu3 %v308_v13 }
  0x22   : > { %329 = vmatpush.msrb.mxu0 %v308_v13  ;;  %470 = vmatpush.msra.mxu1 %v306_v15 }
  0x23   : > { %436 = vmatmul.msk.f32.gmra.mxu0 %vm255_vm0, %v247_v12  ;;  %471 = vmatpush.msra.mxu2 %v306_v15 }
  0x24   : > { %330 = vmatpush.msrb.mxu0 %v307_v14  ;;  %473 = vmatpush.msra.mxu1 %v305_v16 }
  0x25   : > { %474 = vmatpush.msra.mxu2 %v305_v16  ;;  %469 = vmatpush.msra.mxu3 %v307_v14 }
  0x26   : > { %331 = vmatpush.msrb.mxu0 %v306_v15  ;;  %476 = vmatpush.msra.mxu1 %v304_v18 }
  0x27   : > { %477 = vmatpush.msra.mxu2 %v304_v18  ;;  %472 = vmatpush.msra.mxu3 %v306_v15 }
  0x28   : > { %332 = vmatpush.msrb.mxu0 %v305_v16  ;;  %479 = vmatpush.msra.mxu1 %v303_v19 }
  0x29   : > { %475 = vmatpush.msra.mxu3 %v305_v16  ;;  %480 = vmatpush.msra.mxu2 %v303_v19 }
  0x2a   : > { %333 = vmatpush.msrb.mxu0 %v304_v18  ;;  %482 = vmatpush.msra.mxu1 %v302_v20 }
  0x2b   : > { %437 = vmatmul.msk.f32.gmra.mxu0 %vm255_vm0, %v248_v17  ;;  %478 = vmatpush.msra.mxu3 %v304_v18 }
  0x2c   : > { %334 = vmatpush.msrb.mxu0 %v303_v19  ;;  %483 = vmatpush.msra.mxu2 %v302_v20 }
  0x2d   : > { %481 = vmatpush.msra.mxu3 %v303_v19  ;;  %485 = vmatpush.msra.mxu1 %v301_v21 }
  0x2e   : > { %335 = vmatpush.msrb.mxu0 %v302_v20  ;;  %486 = vmatpush.msra.mxu2 %v301_v21 }
  0x2f   : > { %484 = vmatpush.msra.mxu3 %v302_v20 }
  0x30   : > { %336 = vmatpush.msrb.mxu0 %v301_v21 }
  0x31   : > { %487 = vmatpush.msra.mxu3 %v301_v21 }
  0x90   : > { %v285_v23 = vpop.f32.mrf.mxu0 }
  0x91   : > { %v286_v24 = vadd.f32 %v509_v22, %v285_v23 }
  0x93   : > { %v297_v25 = vmax.f32 %v286_v24, 0.0 }
  0x95   : > { %337 = vmatmul.f32.vlgmr.msrb.gmra.mxu0 %v297_v25 }
  0x98   : > { %v288_v26 = vpop.f32.mrf.mxu0 }
  0x99   : > { %v289_v27 = vadd.f32 %v509_v22, %v288_v26 }
  0x9b   : > { %v298_v28 = vmax.f32 %v289_v27, 0.0 }
  0x9d   : > { %340 = vmatmul.f32.vlgmr.msra.gmra.mxu1 %v298_v28 }
  0xa0   : > { %v291_v29 = vpop.f32.mrf.mxu0 }
  0xa1   : > { %v292_v30 = vadd.f32 %v509_v22, %v291_v29 }
  0xa3   : > { %v299_v31 = vmax.f32 %v292_v30, 0.0 }
  0xa5   : > { %343 = vmatmul.f32.vlgmr.msra.gmra.mxu2 %v299_v31 }
  0xa8   : > { %v294_v32 = vpop.f32.mrf.mxu0 }
  0xa9   : > { %v295_v33 = vadd.f32 %v509_v22, %v294_v32 }
  0xab   : > { %v300_v34 = vmax.f32 %v295_v33, 0.0 }
  0xad   : > { %346 = vmatmul.f32.vlgmr.msra.gmra.mxu3 %v300_v34 }
 0x112   : > { %v338_v36 = vpop.f32.mrf.mxu0 }
 0x113   : > { %v339_v37 = vadd.f32 %v510_v35, %v338_v36 }
 0x115   : > { %351 = vst.msk [vmem:[%s243_s17] sm:$0xff] %vm350_vm1, %v339_v37 }
 0x11a   : > { %v341_v38 = vpop.f32.mrf.mxu1 }
 0x11b   : > { %v342_v39 = vadd.f32 %v510_v35, %v341_v38 }
 0x11d   : > { %352 = vst.msk [vmem:[%s243_s17 + $0x8] sm:$0xff] %vm350_vm1, %v342_v39 }
 0x128   : > { %v344_v40 = vpop.f32.mrf.mxu2 }
 0x129   : > { %v345_v41 = vadd.f32 %v510_v35, %v344_v40 }
 0x12b   : > { %353 = vst.msk [vmem:[%s243_s17 + $0x10] sm:$0xff] %vm350_vm1, %v345_v41 }
 0x130   : > { %v347_v42 = vpop.f32.mrf.mxu3 }
 0x131   : > { %v348_v43 = vadd.f32 %v510_v35, %v347_v42 }
 0x133   : > { %354 = vst.msk [vmem:[%s243_s17 + $0x18] sm:$0xff] %vm350_vm1, %v348_v43 }
 0x134 PF: > { %s16_s18 = sadd.s32 1, %s551_s18  }
 0x135   : > { %p13_p7 = scmp.ge.s32.totalorder %s16_s18, 4  }
 0x137   :  { %15 = sbr.rel (!%p13_p7) target bundleno = 1 (0x1), region = 75 }
 0x13c   :  { %377 = vsyncpa [#allocation3], 1 }
 0x13d   :  { %379 = vsyncpa [#allocation3 + $0x1], 1 }

</bundles_post_ra>
